<compile_context>
chip_gen: v7x
topology: tpu7x:2x2x1
jax: 0.10.0
libtpu: 0.0.40
codegen_flags: <defaults>
</compile_context>

<pallas_src>
import jax
import jax.numpy as jnp
from jax.experimental import pallas as pl
from jax.experimental.pallas import tpu as pltpu


def _mlp_kernel(x_ref, w1_ref, b1_ref, w2_ref, b2_ref, o_ref):
    # x: (11, TB), w1: (4, 11), b1: (4, 1) f32, w2: (3, 4) f32, b2: (3, 1) f32
    # Layer 1: (4, 11) @ (11, TB) -> (4, TB), f32 accumulation on the MXU.
    h = jnp.dot(w1_ref[...], x_ref[...], preferred_element_type=jnp.float32)
    # Bias + tanh in f32 (v5e has no bf16 VPU/EUP path); lane-dense over TB.
    h = jnp.tanh(h + b1_ref[...])
    # Layer 2 stays fully in f32: (3, 4) @ (4, TB) -> (3, TB).
    y = jnp.dot(w2_ref[...], h, preferred_element_type=jnp.float32) + b2_ref[...]
    o_ref[...] = y.astype(o_ref.dtype)


def _round_up(n, m):
    return ((n + m - 1) // m) * m


def _cdiv(a, b):
    return -(-a // b)


def _default_block_batch():
    # Target per-step bytes >= ~0.35us * HBM bandwidth for each generation.
    try:
        kind = jax.devices()[0].device_kind.lower()
    except Exception:
        return 16384
    if "v7" in kind:
        return 32768
    if "v6" in kind:
        return 16384
    if "v5" in kind:
        return 8192
    return 16384


def _pick_tiling(batch, block_batch):
    """Choose (tile, padded_batch, steps) with minimal padding waste."""
    b128 = _round_up(max(batch, 1), 128)
    tb_target = max(128, _round_up(int(block_batch), 128))
    steps = _cdiv(b128, tb_target)
    if b128 >= 2 * 128:
        # At least 2 grid steps so both TensorCores engage on v7x; negligible
        # extra overhead elsewhere.
        steps = max(steps, 2)
    tb = _round_up(_cdiv(b128, steps), 128)   # balanced tiles, 128-aligned
    b_pad = steps * tb
    return tb, b_pad, steps


def simple_cnn_forward(x, w1, b1, w2, b2, *,
                       compute_dtype=jnp.float32, block_batch=None,
                       out_dtype=None):
    """Forward pass of SimpleCNN.

    x:  (B, 11)  activations
    w1: (4, 11), b1: (4,)   -- PyTorch nn.Linear(11, 4) layout (out, in)
    w2: (3, 4),  b2: (3,)   -- PyTorch nn.Linear(4, 3) layout (out, in)
    Returns (B, 3) in `out_dtype` (default: x.dtype).
    """
    B = x.shape[0]
    d_in = w1.shape[1]      # 11
    d_hid = w1.shape[0]     # 4
    d_out = w2.shape[0]     # 3
    if out_dtype is None:
        out_dtype = x.dtype
    if block_batch is None:
        block_batch = _default_block_batch()

    tb, b_pad, _steps = _pick_tiling(B, block_batch)

    # Batch-on-lanes layout: (B, 11) -> (11, B_pad).  Under jit this producer
    # is allowed to fuse into the pallas_call operand (allow_input_fusion).
    x_t = jnp.transpose(x)                                  # (11, B)
    if b_pad != B:
        x_t = jnp.pad(x_t, ((0, 0), (0, b_pad - B)))
    x_t = x_t.astype(compute_dtype)

    w1c = w1.astype(compute_dtype)                          # (4, 11)
    w2c = w2.astype(jnp.float32)                            # (3, 4), resident f32
    b1c = b1.reshape(d_hid, 1).astype(jnp.float32)          # (4, 1)
    b2c = b2.reshape(d_out, 1).astype(jnp.float32)          # (3, 1)

    grid = (b_pad // tb,)
    const = lambda i: (0, 0)   # weights/biases resident across grid steps

    out_t = pl.pallas_call(
        _mlp_kernel,
        out_shape=jax.ShapeDtypeStruct((d_out, b_pad), out_dtype),
        grid=grid,
        in_specs=[
            pl.BlockSpec((d_in, tb), lambda i: (0, i)),     # x tile streams
            pl.BlockSpec((d_hid, d_in), const),             # w1 resident
            pl.BlockSpec((d_hid, 1), const),                # b1 resident
            pl.BlockSpec((d_out, d_hid), const),            # w2 resident
            pl.BlockSpec((d_out, 1), const),                # b2 resident
        ],
        out_specs=pl.BlockSpec((d_out, tb), lambda i: (0, i)),
        compiler_params=pltpu.CompilerParams(
            dimension_semantics=("parallel",),
            allow_input_fusion=[0]),
    )(x_t, w1c, b1c, w2c, b2c)

    # Drop batch padding and transpose back to (B, 3).
    # TODO(synk): in a real pipeline keep (features, batch) layout across the
    # surrounding graph to avoid this extra HBM pass.
    return jnp.transpose(out_t[:, :B]).astype(out_dtype)


def init_params(key):
    # Deterministic init mimicking torch.nn.Linear defaults:
    # U(-1/sqrt(fan_in), 1/sqrt(fan_in)); weight layout is (out, in).
    k1, k2, k3, k4 = jax.random.split(key, 4)
    bound1 = 1.0 / jnp.sqrt(11.0)
    bound2 = 1.0 / jnp.sqrt(4.0)
    w1 = jax.random.uniform(k1, (4, 11), jnp.float32, -bound1, bound1)
    b1 = jax.random.uniform(k2, (4,), jnp.float32, -bound1, bound1)
    w2 = jax.random.uniform(k3, (3, 4), jnp.float32, -bound2, bound2)
    b2 = jax.random.uniform(k4, (3,), jnp.float32, -bound2, bound2)
    return w1, b1, w2, b2


if __name__ == "__main__":
    key = jax.random.PRNGKey(0)
    kx, kx2, kp = jax.random.split(key, 3)

    fwd = jax.jit(simple_cnn_forward,
                  static_argnames=("compute_dtype", "block_batch", "out_dtype"))

    w1, b1, w2, b2 = init_params(kp)

    # --- Small batch (single grid step), f32 streaming: tight check. ---
    B = 8
    x = jax.random.normal(kx, (B, 11), jnp.float32)
    ref = jnp.tanh(x @ w1.T + b1) @ w2.T + b2     # PyTorch convention
    out_f32 = jax.block_until_ready(fwd(x, w1, b1, w2, b2))
    assert out_f32.shape == (B, 3)
    assert jnp.allclose(out_f32, ref, atol=1e-5, rtol=1e-5)

    # --- Non-aligned batch (multi-step grid + padding path), f32. ---
    B2 = 300
    x2 = jax.random.normal(kx2, (B2, 11), jnp.float32)
    ref2 = jnp.tanh(x2 @ w1.T + b1) @ w2.T + b2
    out2 = jax.block_until_ready(fwd(x2, w1, b1, w2, b2))
    assert out2.shape == (B2, 3)
    assert jnp.allclose(out2, ref2, atol=1e-5, rtol=1e-5)

    # --- Optional bf16 streaming path (for upstream-bf16 inputs): loose check.
    out_bf16 = jax.block_until_ready(
        fwd(x, w1, b1, w2, b2, compute_dtype=jnp.bfloat16))
    assert out_bf16.shape == (B, 3)
    assert jnp.allclose(out_bf16, ref, atol=5e-2, rtol=5e-2)

    print("KERNEL_OK")
</pallas_src>

<mosaic_0001>
module attributes {stable_mosaic.version = 11 : i64} {
  func.func @_mlp_kernel(%arg0: i32, %arg1: memref<11x128xf32, #tpu.memory_space<vmem>>, %arg2: memref<4x11xf32, #tpu.memory_space<vmem>>, %arg3: memref<4x1xf32, #tpu.memory_space<vmem>>, %arg4: memref<3x4xf32, #tpu.memory_space<vmem>>, %arg5: memref<3x1xf32, #tpu.memory_space<vmem>>, %arg6: memref<3x128xf32, #tpu.memory_space<vmem>>) attributes {dimension_semantics = [#tpu.dimension_semantics<parallel>], iteration_bounds = array<i64: 1>, scalar_prefetch = 0 : i64, scratch_operands = 0 : i64, tpu.core_type = #tpu.core_type<tc>, window_params = [{transform_indices = @transform_0, window_bounds = array<i64: 11, 128>}, {pipeline_mode = #tpu.pipeline_mode<synchronous>, transform_indices = @transform_1, window_bounds = array<i64: 4, 11>}, {pipeline_mode = #tpu.pipeline_mode<synchronous>, transform_indices = @transform_2, window_bounds = array<i64: 4, 1>}, {pipeline_mode = #tpu.pipeline_mode<synchronous>, transform_indices = @transform_3, window_bounds = array<i64: 3, 4>}, {pipeline_mode = #tpu.pipeline_mode<synchronous>, transform_indices = @transform_4, window_bounds = array<i64: 3, 1>}, {transform_indices = @transform_5, window_bounds = array<i64: 3, 128>}]} {
    %c0 = arith.constant 0 : index
    %c0_0 = arith.constant 0 : index
    %0 = vector.load %arg2[%c0, %c0_0] : memref<4x11xf32, #tpu.memory_space<vmem>>, vector<4x11xf32>
    %c0_1 = arith.constant 0 : index
    %c0_2 = arith.constant 0 : index
    %1 = vector.load %arg1[%c0_1, %c0_2] : memref<11x128xf32, #tpu.memory_space<vmem>>, vector<11x128xf32>
    %cst = arith.constant dense<0.000000e+00> : vector<4x128xf32>
    %2 = tpu.matmul %0, %1, %cst {dimension_numbers = #tpu.dot_dimension_numbers<[1], [0], [0], [1], [0, 0, 1, 1], [], []>} : vector<4x11xf32>, vector<11x128xf32>, vector<4x128xf32> -> vector<4x128xf32>
    %c0_3 = arith.constant 0 : index
    %c0_4 = arith.constant 0 : index
    %3 = vector.load %arg3[%c0_3, %c0_4] : memref<4x1xf32, #tpu.memory_space<vmem>>, vector<4x1xf32>
    %4 = vector.broadcast %3 : vector<4x1xf32> to vector<4x128xf32>
    %5 = arith.addf %2, %4 : vector<4x128xf32>
    %6 = math.tanh %5 : vector<4x128xf32>
    %c0_5 = arith.constant 0 : index
    %c0_6 = arith.constant 0 : index
    %7 = vector.load %arg4[%c0_5, %c0_6] : memref<3x4xf32, #tpu.memory_space<vmem>>, vector<3x4xf32>
    %cst_7 = arith.constant dense<0.000000e+00> : vector<3x128xf32>
    %8 = tpu.matmul %7, %6, %cst_7 {dimension_numbers = #tpu.dot_dimension_numbers<[1], [0], [0], [1], [0, 0, 1, 1], [], []>} : vector<3x4xf32>, vector<4x128xf32>, vector<3x128xf32> -> vector<3x128xf32>
    %c0_8 = arith.constant 0 : index
    %c0_9 = arith.constant 0 : index
    %9 = vector.load %arg5[%c0_8, %c0_9] : memref<3x1xf32, #tpu.memory_space<vmem>>, vector<3x1xf32>
    %10 = vector.broadcast %9 : vector<3x1xf32> to vector<3x128xf32>
    %11 = arith.addf %8, %10 : vector<3x128xf32>
    %c0_10 = arith.constant 0 : index
    %c0_11 = arith.constant 0 : index
    %12 = vector.load %arg6[%c0_10, %c0_11] : memref<3x128xf32, #tpu.memory_space<vmem>>, vector<3x128xf32>
    tpu.vector_store %arg6[%c0_10, %c0_11], %11 {strides = array<i32>} : memref<3x128xf32, #tpu.memory_space<vmem>>, vector<3x128xf32>,
    return
  }
  func.func @transform_0(%arg0: i32) -> (i32, i32) {
    %c0_i32 = arith.constant 0 : i32
    %c0_i32_0 = arith.constant 0 : i32
    return %c0_i32, %arg0 : i32, i32
  }
  func.func @transform_1(%arg0: i32) -> (i32, i32) {
    %c0_i32 = arith.constant 0 : i32
    %c0_i32_0 = arith.constant 0 : i32
    %c0_i32_1 = arith.constant 0 : i32
    return %c0_i32, %c0_i32_0 : i32, i32
  }
  func.func @transform_2(%arg0: i32) -> (i32, i32) {
    %c0_i32 = arith.constant 0 : i32
    %c0_i32_0 = arith.constant 0 : i32
    %c0_i32_1 = arith.constant 0 : i32
    return %c0_i32, %c0_i32_0 : i32, i32
  }
  func.func @transform_3(%arg0: i32) -> (i32, i32) {
    %c0_i32 = arith.constant 0 : i32
    %c0_i32_0 = arith.constant 0 : i32
    %c0_i32_1 = arith.constant 0 : i32
    return %c0_i32, %c0_i32_0 : i32, i32
  }
  func.func @transform_4(%arg0: i32) -> (i32, i32) {
    %c0_i32 = arith.constant 0 : i32
    %c0_i32_0 = arith.constant 0 : i32
    %c0_i32_1 = arith.constant 0 : i32
    return %c0_i32, %c0_i32_0 : i32, i32
  }
  func.func @transform_5(%arg0: i32) -> (i32, i32) {
    %c0_i32 = arith.constant 0 : i32
    %c0_i32_0 = arith.constant 0 : i32
    return %c0_i32, %arg0 : i32, i32
  }
}

</mosaic_0001>

<bundles_post_ra>
// kernel: simple_cnn_forward.1
= control target key start
LH: loop header
LB: loop body
LE: loop exit
PB: predicated region body
PF: predicated region fallthrough
CT: control target
= control target key end

     0   :  { %vm33_vm0 = vcmask 1042432   ;;  %v231_v0 = vmov 0.0|0.0   ;;  %vm232_vm1 = vmmov 1   ;;  %vm233_vm3 = vmmov 0   ;;  %s287_s0 = inlined_call_operand.vmem [shape: f32[11,128], index: 0, kind: input, shape index: {}]   ;;  %s288_s2 = inlined_call_operand.vmem [shape: f32[4,1], index: 2, kind: input, shape index: {}]   ;;  %s289_s1 = inlined_call_operand.vmem [shape: f32[4,11], index: 1, kind: input, shape index: {}]   ;;  %s290_s4 = inlined_call_operand.vmem [shape: f32[3,1], index: 4, kind: input, shape index: {}]   ;;  %s291_s3 = inlined_call_operand.vmem [shape: f32[3,4], index: 3, kind: input, shape index: {}]   ;;  %s292_s5 = inlined_call_operand.vmem [shape: f32[3,128], index: 5, kind: output, shape index: {}]  }
   0x1   :  { %219 = vmatprep.subr.bf16.mxu0 %v231_v0  ;;  %v21_v1 = vld [vmem:[%s287_s0] sm:$0xff]  ;;  %v22_v2 = vld [vmem:[%s287_s0 + $0x8] sm:$0x7]  ;;  %vm221_vm2 = vmpackc.low %vm33_vm0, %vm232_vm1  ;;  %v234_v4 = vmov 0.0   ;;  %v235_v5 = vmov 0   ;;  %vm29_vm4 = vcmask 89088  }
   0x2   :  { %v220_v3 = vpack.c.bf16 %v22_v2, %v21_v1  ;;  %211 = vmatprep.mubr.msk.f32.mxu0 %vm233_vm3, %v234_v4  ;;  %228 = vset.pattern.permute.xlu0 %v235_v5  ;;  %v23_v6 = vld [vmem:[%s288_s2] sm:$0xf]  ;;  %vm119_vm5 = vcmask 1043456   ;;  %vm115_vm6 = vcmask 31744  }
   0x3   :  { %26 = vperm.xlu0 %228, %v23_v6   ;;  %214 = vmatprep.subr.mxu1 %v234_v4  ;;  %v20_v7 = vld [vmem:[%s289_s1] sm:$0xf] }
   0x4   :  { %222 = vmatpush3.bf16.msk.msra.mxu0 %vm221_vm2, %v220_v3  ;;  %v109_v8 = vld [vmem:[%s290_s4] sm:$0x7]  ;;  %216 = vmatprep.mubr.msk.f32.mxu1 %vm233_vm3, %v234_v4 }
   0x5   :  { %v108_v13 = vld [vmem:[%s291_s3] sm:$0x7] }
   0x7   :  { %212 = vmatmul.mubr.msk.f32.vlgmr.msra.gmra.mrb[0].mxu0 %vm29_vm4, %v20_v7  ;;  %112 = vperm.xlu0 %228, %v109_v8  }
  0x82   :  { %v27_v9 = vpop.permute.xlu0 %26 }
  0x86   :  { %v113_v15 = vpop.permute.xlu0 %112 }
  0xda   :  { %v103_v10 = vpop.f32.mrb[0].mxu0 }
  0xdb   :  { %v104_v11 = vadd.f32 %v103_v10, %v27_v9  ;;  %v213_v12 = vpop.f32.mrb[1].mxu0 }
  0xdd   :  { %229 = vtanh.f32 %v104_v11 }
  0xe7   :  { %v230_v14 = vpop.eup %229 }
  0xe8   :  { %215 = vmatpush3.msk.msra.mxu1 %vm119_vm5, %v230_v14 }
  0xe9   :  { %217 = vmatmul.mubr.msk.f32.vlgmr.msra.gmra.mrb[0].mxu1 %vm115_vm6, %v108_v13 }
 0x1bc   :  { %v189_v16 = vpop.f32.mrb[0].mxu1 }
 0x1bd   :  { %v190_v17 = vadd.f32 %v189_v16, %v113_v15  ;;  %v218_v18 = vpop.f32.mrb[1].mxu1 }
 0x1bf   :  { %193 = vst [vmem:[%s292_s5] sm:$0x7] %v190_v17 }

</bundles_post_ra>
